<compile_context>
chip_gen: v6e
topology: v6e:2x2x1
jax: 0.10.0
libtpu: 0.0.40
codegen_flags: <defaults>
</compile_context>

<pallas_src>
import jax
import jax.numpy as jnp
from jax.experimental import pallas as pl
from jax.experimental.pallas import tpu as pltpu

HIDDEN = 32        # the_bert.config.hidden_size (small synthetic value)
NUM_CLASSES = 2


def _round_up(x, m):
    return ((x + m - 1) // m) * m


def _classifier_kernel(x_ref, w_ref, b_ref, o_ref):
    # x_ref: (TM, H)   w_ref: (C, H)   b_ref: (C, 1)   o_ref: (C, TM)
    # Contract H against H directly (no .T -> no per-step XLU transpose); the
    # class-major result keeps the output's last dim lane-dense.
    acc = jax.lax.dot_general(
        w_ref[...], x_ref[...],
        dimension_numbers=(((1,), (1,)), ((), ())),
        preferred_element_type=jnp.float32,
    )
    o_ref[...] = (acc + b_ref[...]).astype(o_ref.dtype)


def linear_classifier(x, w, b, *, tile_m=8192, small_m_threshold=2048,
                      force_pallas=False, class_major_out=False):
    """x: [B, S, H]; w: [C, H]; b: [C]  ->  [B, S, C] (or [C, B*S] if class_major_out)."""
    B, S, H = x.shape
    C = w.shape[0]
    M = B * S

    w = w.astype(x.dtype)

    # Small-M fast path: one fused XLA dot beats kernel launch + wrapper glue.
    if M <= small_m_threshold and not force_pallas:
        y = x.reshape(M, H) @ w.T + b.astype(x.dtype)
        return y.T if class_major_out else y.reshape(B, S, C)

    x2d = x.reshape(M, H)

    # Lane-dense M tile (multiple of 128). No padding: the grid overhangs M and the
    # out-of-bounds part of the last block is masked on writeback.
    tm = min(tile_m, _round_up(M, 128))
    # Keep >= 2 grid steps when M allows, so the "parallel" axis shards across
    # v7x's 2 TensorCores instead of idling half the chip.
    if pl.cdiv(M, tm) < 2 and M > 128:
        tm = _round_up(pl.cdiv(M, 2), 128)
    grid = (pl.cdiv(M, tm),)

    b_col = b.reshape(C, 1).astype(jnp.float32)

    cost = pl.CostEstimate(
        flops=2 * M * H * C,
        transcendentals=0,
        bytes_accessed=(M * H + M * C + H * C) * x.dtype.itemsize + C * 4,
    )

    out_cm = pl.pallas_call(
        _classifier_kernel,
        out_shape=jax.ShapeDtypeStruct((C, M), x.dtype),
        grid_spec=pltpu.PrefetchScalarGridSpec(
            num_scalar_prefetch=0,
            grid=grid,
            in_specs=[
                pl.BlockSpec((tm, H), lambda i: (i, 0)),   # x tile, walks M
                pl.BlockSpec((C, H), lambda i: (0, 0)),    # W, resident
                pl.BlockSpec((C, 1), lambda i: (0, 0)),    # b, resident
            ],
            out_specs=pl.BlockSpec((C, tm), lambda i: (0, i)),  # class-major, lane-dense
        ),
        compiler_params=pltpu.CompilerParams(
            dimension_semantics=("parallel",),
            # Raise v5e's 16 MiB scoped-VMEM default so TM=8192 f32 (~8.5 MiB
            # double-buffered) fits on all generations; stays below v7x's 64 MiB.
            vmem_limit_bytes=32 * 1024 * 1024,
        ),
        cost_estimate=cost,
    )(x2d, w, b_col)
    # TODO(synk): on v7x, sweep pipeline_mode=pl.Buffered(3) on the x BlockSpec; keep
    # only if it measures (review flagged it as a <=5-10% marginal win).

    if class_major_out:
        return out_cm                      # (C, M): skip the post-hoc transpose
    return out_cm.T.reshape(B, S, C)       # tiny XLA transpose back to row-major


if __name__ == "__main__":
    key = jax.random.PRNGKey(0)
    kx, kw, kb = jax.random.split(key, 3)

    B, S = 2, 8
    # NOTE: if the surrounding BERT runs bf16, pass bf16 x here (the kernel still
    # accumulates in f32); f32 kept to match the PyTorch module's default dtype.
    x = jax.random.normal(kx, (B, S, HIDDEN), dtype=jnp.float32)

    # Deterministic synthetic parameters (nn.Linear(hidden_size, 2) shapes).
    w = jax.random.normal(kw, (NUM_CLASSES, HIDDEN), dtype=jnp.float32) * 0.02
    b = jax.random.normal(kb, (NUM_CLASSES,), dtype=jnp.float32) * 0.02

    # TODO(synk): dropout is a no-op at inference; no PRNG masking implemented.

    # 1) Small-shape check, forcing the Pallas path (default routing would take the
    #    small-M XLA fast path for M=16).
    y = linear_classifier(x, w, b, force_pallas=True)
    jax.block_until_ready(y)
    y_ref = x @ w.T + b
    assert y.shape == (B, S, NUM_CLASSES)
    assert jnp.allclose(y, y_ref, atol=1e-5), "small-shape mismatch vs reference"

    # 2) Multi-block ragged check: M=519 not a multiple of the 256 tile, grid >= 2
    #    steps, last block overhangs (exercises the masked writeback path).
    B2, S2 = 3, 173
    x2 = jax.random.normal(kx, (B2, S2, HIDDEN), dtype=jnp.float32)
    y2 = linear_classifier(x2, w, b, tile_m=256, force_pallas=True)
    jax.block_until_ready(y2)
    y2_ref = x2 @ w.T + b
    assert jnp.allclose(y2, y2_ref, atol=1e-5), "ragged multi-block mismatch vs reference"

    # 3) Small-M fast path (plain XLA) sanity check.
    y3 = linear_classifier(x, w, b)
    jax.block_until_ready(y3)
    assert jnp.allclose(y3, y_ref, atol=1e-5), "fast-path mismatch vs reference"

    print("KERNEL_OK")
</pallas_src>

<mosaic_0001>
module attributes {stable_mosaic.version = 11 : i64} {
  func.func @_classifier_kernel(%arg0: i32, %arg1: memref<128x32xf32, #tpu.memory_space<vmem>>, %arg2: memref<2x32xf32, #tpu.memory_space<vmem>>, %arg3: memref<2x1xf32, #tpu.memory_space<vmem>>, %arg4: memref<2x128xf32, #tpu.memory_space<vmem>>) attributes {dimension_semantics = [#tpu.dimension_semantics<parallel>], iteration_bounds = array<i64: 1>, scalar_prefetch = 0 : i64, scratch_operands = 0 : i64, tpu.core_type = #tpu.core_type<tc>, window_params = [{transform_indices = @transform_0, window_bounds = array<i64: 128, 32>}, {pipeline_mode = #tpu.pipeline_mode<synchronous>, transform_indices = @transform_1, window_bounds = array<i64: 2, 32>}, {pipeline_mode = #tpu.pipeline_mode<synchronous>, transform_indices = @transform_2, window_bounds = array<i64: 2, 1>}, {transform_indices = @transform_3, window_bounds = array<i64: 2, 128>}]} {
    %c0 = arith.constant 0 : index
    %c0_0 = arith.constant 0 : index
    %0 = vector.load %arg2[%c0, %c0_0] : memref<2x32xf32, #tpu.memory_space<vmem>>, vector<2x32xf32>
    %c0_1 = arith.constant 0 : index
    %c0_2 = arith.constant 0 : index
    %1 = vector.load %arg1[%c0_1, %c0_2] : memref<128x32xf32, #tpu.memory_space<vmem>>, vector<128x32xf32>
    %cst = arith.constant dense<0.000000e+00> : vector<2x128xf32>
    %2 = tpu.matmul %0, %1, %cst {dimension_numbers = #tpu.dot_dimension_numbers<[1], [1], [0], [0], [0, 0, 1, 0], [], []>} : vector<2x32xf32>, vector<128x32xf32>, vector<2x128xf32> -> vector<2x128xf32>
    %c0_3 = arith.constant 0 : index
    %c0_4 = arith.constant 0 : index
    %3 = vector.load %arg3[%c0_3, %c0_4] : memref<2x1xf32, #tpu.memory_space<vmem>>, vector<2x1xf32>
    %4 = vector.broadcast %3 : vector<2x1xf32> to vector<2x128xf32>
    %5 = arith.addf %2, %4 : vector<2x128xf32>
    %c0_5 = arith.constant 0 : index
    %c0_6 = arith.constant 0 : index
    %6 = vector.load %arg4[%c0_5, %c0_6] : memref<2x128xf32, #tpu.memory_space<vmem>>, vector<2x128xf32>
    tpu.vector_store %arg4[%c0_5, %c0_6], %5 {strides = array<i32>} : memref<2x128xf32, #tpu.memory_space<vmem>>, vector<2x128xf32>,
    return
  }
  func.func @transform_0(%arg0: i32) -> (i32, i32) {
    %c0_i32 = arith.constant 0 : i32
    %c0_i32_0 = arith.constant 0 : i32
    return %arg0, %c0_i32 : i32, i32
  }
  func.func @transform_1(%arg0: i32) -> (i32, i32) {
    %c0_i32 = arith.constant 0 : i32
    %c0_i32_0 = arith.constant 0 : i32
    %c0_i32_1 = arith.constant 0 : i32
    return %c0_i32, %c0_i32_0 : i32, i32
  }
  func.func @transform_2(%arg0: i32) -> (i32, i32) {
    %c0_i32 = arith.constant 0 : i32
    %c0_i32_0 = arith.constant 0 : i32
    %c0_i32_1 = arith.constant 0 : i32
    return %c0_i32, %c0_i32_0 : i32, i32
  }
  func.func @transform_3(%arg0: i32) -> (i32, i32) {
    %c0_i32 = arith.constant 0 : i32
    %c0_i32_0 = arith.constant 0 : i32
    return %c0_i32, %arg0 : i32, i32
  }
}

</mosaic_0001>

<bundles_post_ra>
// kernel: tpu_custom_call.1
= control target key start
LH: loop header
LB: loop body
LE: loop exit
PB: predicated region body
PF: predicated region fallthrough
CT: control target
= control target key end

     0   :  { %8 = vsyncpa [#allocation3], 0  ;;  %s367_s0 = inlined_call_operand.hbm [shape: f32[16,32], index: 0, kind: input, shape index: {}]   ;;  %s368_s1 = inlined_call_operand.vmem [shape: f32[2,32], index: 1, kind: input, shape index: {}]   ;;  %s369_s2 = inlined_call_operand.vmem [shape: f32[2,1], index: 2, kind: input, shape index: {}]   ;;  %s370_s3 = inlined_call_operand.hbm [shape: f32[2,16], index: 3, kind: output, shape index: {}]  }
   0x1   :  { %9 = vsyncpa [#allocation4], 0 }
   0x2   :  { %14 = vsyncadd [#allocation3], 1792  ;;  %s311_s12 = smov [#allocation2]  }
   0x3   :  { %s15_s13 = sshll.u32 %s311_s12, 4  ;;  %s16_s13 = int_to_ptr.vmem [resolvable:$true] %s15_s13 }
   0x4   :  { %s275_s14 = scalar_lea.vmem %s16_s13, 256  ;;  %s279_s15 = scalar_lea.vmem %s16_s13, 2048 }
   0x5   :  { %p276_p0 = scmp.ne.s32.totalorder %s16_s13, %s275_s14  ;;  %p280_p1 = scmp.lt.s32.totalorder %s16_s13, %s16_s13 }
   0x6   :  { %p281_p2 = scmp.lt.s32.totalorder %s279_s15, %s275_s14 }
   0x8   :  { %p282_p3 = por %p281_p2, %p280_p1 }
   0xa   :  { %p283_p4 = pnand %p282_p3, %p276_p0 }
   0xc   :  { %286 = shalt.err (!%p283_p4)
}
   0xd   :  { %s312_s16 = smov 128   ;;  %s313_s17 = smov 8  }
   0xe   :  { %21 = dma.hbm_to_vmem [thread:$0]  %s367_s0, 256, %s16_s13, [#allocation3], %s312_s16, %s312_s16, %s313_s17  }
   0xf   :  { %307 = dma.done.wait [#allocation3], 2048  }
  0x10   :  { %308 = vsyncadd [#allocation3], 4294965248  ;;  %v314_v0 = vmov 0.0   ;;  %vm315_vm0 = vmmov 0   ;;  %v316_v1 = vmov 0   ;;  %vm52_vm1 = vcmask 261120  }
  0x11   :  { %224 = vmatprep.subr.mxu0 %v314_v0  ;;  %256 = vmatprep.mubr.msk.f32.mxu0 %vm315_vm0, %v314_v0  ;;  %v45_v2 = vld [vmem:[#allocation2 + $0x78] sm:$0xff]  ;;  %v44_v3 = vld [vmem:[#allocation2 + $0x70] sm:$0xff]  ;;  %v46_v4 = vld [vmem:[%s369_s2] sm:$0x3]  ;;  %s317_s22 = smov [#allocation5]  }
  0x12   :  { %266 = vset.pattern.permute.xlu0 %v316_v1  ;;  %225 = vmatpush3.xpose.msk.msra.mxu0 %vm52_vm1, %v45_v2  ;;  %v43_v5 = vld [vmem:[#allocation2 + $0x68] sm:$0xff]  ;;  %v42_v6 = vld [vmem:[#allocation2 + $0x60] sm:$0xff]  ;;  %v41_v7 = vld [vmem:[#allocation2 + $0x58] sm:$0xff]  ;;  %s181_s23 = sshll.u32 %s317_s22, 4  ;;  %s182_s23 = int_to_ptr.vmem [resolvable:$true] %s181_s23 }
  0x13   :  { %226 = vmatprep.subr.mxu0 %v314_v0  ;;  %49 = vperm.xlu0 %266, %v46_v4   ;;  %v40_v8 = vld [vmem:[#allocation2 + $0x50] sm:$0xff]  ;;  %v39_v9 = vld [vmem:[#allocation2 + $0x48] sm:$0xff]  ;;  %v38_v10 = vld [vmem:[#allocation2 + $0x40] sm:$0xff]  ;;  %s287_s24 = scalar_lea.vmem %s182_s23, 32  ;;  %p292_p6 = scmp.lt.s32.totalorder %s182_s23, %s182_s23 }
  0x14   :  { %v37_v11 = vld [vmem:[#allocation2 + $0x38] sm:$0xff]  ;;  %v36_v12 = vld [vmem:[#allocation2 + $0x30] sm:$0xff]  ;;  %v35_v13 = vld [vmem:[#allocation2 + $0x28] sm:$0xff]  ;;  %p288_p5 = scmp.ne.s32.totalorder %s182_s23, %s287_s24  ;;  %p293_p7 = scmp.lt.s32.totalorder %s287_s24, %s287_s24 }
  0x15   :  { %v34_v14 = vld [vmem:[#allocation2 + $0x20] sm:$0xff]  ;;  %v33_v15 = vld [vmem:[#allocation2 + $0x18] sm:$0xff]  ;;  %v32_v16 = vld [vmem:[#allocation2 + $0x10] sm:$0xff] }
  0x16   :  { %227 = vmatpush3.xpose.msk.msra.mxu0 %vm52_vm1, %v44_v3  ;;  %v31_v17 = vld [vmem:[#allocation2 + $0x8] sm:$0xff]  ;;  %v30_v18 = vld [vmem:[#allocation2] sm:$0xff]  ;;  %p294_p8 = por %p293_p7, %p292_p6 }
  0x17   :  { %228 = vmatprep.subr.mxu0 %v314_v0  ;;  %v29_v19 = vld [vmem:[%s368_s1] sm:$0x3] }
  0x18   :  { %p295_p9 = pnand %p294_p8, %p288_p5 }
  0x1a   :  { %229 = vmatpush3.xpose.msk.msra.mxu0 %vm52_vm1, %v43_v5 }
  0x1b   :  { %230 = vmatprep.subr.mxu0 %v314_v0 }
  0x1e   :  { %231 = vmatpush3.xpose.msk.msra.mxu0 %vm52_vm1, %v42_v6 }
  0x1f   :  { %232 = vmatprep.subr.mxu0 %v314_v0 }
  0x22   :  { %233 = vmatpush3.xpose.msk.msra.mxu0 %vm52_vm1, %v41_v7 }
  0x23   :  { %234 = vmatprep.subr.mxu0 %v314_v0 }
  0x26   :  { %235 = vmatpush3.xpose.msk.msra.mxu0 %vm52_vm1, %v40_v8 }
  0x27   :  { %236 = vmatprep.subr.mxu0 %v314_v0 }
  0x2a   :  { %237 = vmatpush3.xpose.msk.msra.mxu0 %vm52_vm1, %v39_v9 }
  0x2b   :  { %238 = vmatprep.subr.mxu0 %v314_v0 }
  0x2e   :  { %239 = vmatpush3.xpose.msk.msra.mxu0 %vm52_vm1, %v38_v10 }
  0x2f   :  { %240 = vmatprep.subr.mxu0 %v314_v0 }
  0x32   :  { %241 = vmatpush3.xpose.msk.msra.mxu0 %vm52_vm1, %v37_v11 }
  0x33   :  { %242 = vmatprep.subr.mxu0 %v314_v0 }
  0x36   :  { %243 = vmatpush3.xpose.msk.msra.mxu0 %vm52_vm1, %v36_v12 }
  0x37   :  { %244 = vmatprep.subr.mxu0 %v314_v0 }
  0x3a   :  { %245 = vmatpush3.xpose.msk.msra.mxu0 %vm52_vm1, %v35_v13 }
  0x3b   :  { %246 = vmatprep.subr.mxu0 %v314_v0 }
  0x3e   :  { %247 = vmatpush3.xpose.msk.msra.mxu0 %vm52_vm1, %v34_v14 }
  0x3f   :  { %248 = vmatprep.subr.mxu0 %v314_v0 }
  0x42   :  { %249 = vmatpush3.xpose.msk.msra.mxu0 %vm52_vm1, %v33_v15 }
  0x43   :  { %250 = vmatprep.subr.mxu0 %v314_v0 }
  0x46   :  { %251 = vmatpush3.xpose.msk.msra.mxu0 %vm52_vm1, %v32_v16 }
  0x47   :  { %252 = vmatprep.subr.mxu0 %v314_v0 }
  0x4a   :  { %253 = vmatpush3.xpose.msk.msra.mxu0 %vm52_vm1, %v31_v17 }
  0x4b   :  { %254 = vmatprep.subr.mxu0 %v314_v0 }
  0x4e   :  { %255 = vmatpush3.xpose.msk.msra.mxu0 %vm52_vm1, %v30_v18 }
  0x51   :  { %257 = vmatmul.mubr.msk.f32.vlgmr.msra.gmra.mxu0 %vm52_vm1, %v29_v19 }
  0x8e   :  { %v50_v20 = vpop.permute.xlu0 %49 }
 0x111   :  { %v170_v21 = vpop.f32.mrf.mxu0 }
 0x112   :  { %v171_v22 = vadd.f32 %v170_v21, %v50_v20 }
 0x113   :  { %v258_v23 = vpop.f32.mrf.mxu0 }
 0x114   :  { %174 = vst [vmem:[#allocation5] sm:$0x3] %v171_v22 }
 0x115   :  { %298 = shalt.err (!%p295_p9)
}
 0x116   :  { %184 = dma.vmem_to_hbm [thread:$0]  %s182_s23, 32, %s370_s3, [#allocation4]  }
 0x117   :  { %309 = dma.done.wait [#allocation4], 32  }
 0x118   :  { %310 = vsyncadd [#allocation4], 4294967264 }
 0x119   :  { %188 = vsyncpa [#allocation3], 1 }
 0x11a   :  { %189 = vsyncpa [#allocation4], 1 }

</bundles_post_ra>
